<compile_context>
chip_gen: v5e
topology: v5e:2x2
jax: 0.10.0
libtpu: 0.0.40
codegen_flags: <defaults>
</compile_context>

<pallas_src>
import jax
import jax.numpy as jnp
from jax.experimental import pallas as pl
from jax.experimental.pallas import tpu as pltpu


def _round_up(v, m):
    return (v + m - 1) // m * m


def _tpu_kind():
    try:
        return jax.devices()[0].device_kind.lower()
    except Exception:
        return ""


def _vmem_cap_bytes():
    # v7x has 64 MiB VMEM per TensorCore; v5e/v6e have 128 MiB.
    return (64 << 20) if "v7" in _tpu_kind() else (128 << 20)


def _auto_hidden_tile(D, Hp, wt_itemsize):
    """Largest hidden tile (multiple of 128, divides Hp) whose double-buffered
    weight slab stays within ~40% of physical VMEM."""
    budget = int(0.4 * _vmem_cap_bytes())
    m = Hp // 128
    cands = sorted({128 * d for d in range(1, m + 1) if m % d == 0}, reverse=True)
    for th in cands:
        if 2 * (D + Hp) * 3 * th * wt_itemsize <= budget:
            return th
    return 128


def _gru_cell_kernel(x_ref, h_ref, wi_ref, wh_ref, bg_ref, bhn_ref, o_ref):
    th = o_ref.shape[-1]          # hidden tile width (multiple of 128)
    Hp = h_ref.shape[-1]          # padded hidden width
    wdt = wi_ref.dtype            # matmul operand dtype (bf16 by default)

    h = h_ref[...]
    x = x_ref[...].astype(wdt)
    h_mm = h.astype(wdt)

    # Two fused, lane-dense MXU matmuls with f32 accumulation.
    # Columns of wi/wh for this hidden tile are laid out [r | z | n], each th wide.
    gi = jnp.dot(x, wi_ref[...], preferred_element_type=jnp.float32) + bg_ref[...]
    gh = jnp.dot(h_mm, wh_ref[...], preferred_element_type=jnp.float32)

    # sigmoid(a) = 0.5*tanh(0.5*a) + 0.5 : one EUP push (tanh) instead of two
    # (exp + reciprocal).  Mathematically exact.
    r = 0.5 * jnp.tanh(0.5 * (gi[:, :th] + gh[:, :th])) + 0.5
    z = 0.5 * jnp.tanh(0.5 * (gi[:, th:2 * th] + gh[:, th:2 * th])) + 0.5
    n = jnp.tanh(gi[:, 2 * th:] + r * (gh[:, 2 * th:] + bhn_ref[...]))

    # h slice for the blend: only this hidden tile's columns, kept in f32.
    if Hp == th:
        hf = h.astype(jnp.float32)
    else:
        j = pl.program_id(0)
        start = pl.multiple_of(j * th, 128)
        hf = h_ref[:, pl.ds(start, th)].astype(jnp.float32)

    # n + z*(h - n) == (1-z)*n + z*h, one fewer VPU multiply.
    o_ref[...] = (n + z * (hf - n)).astype(o_ref.dtype)


def prepare_gru_params(weight_ih, weight_hh, bias_ih, bias_hh,
                       compute_dtype=jnp.bfloat16, hidden_tile=None):
    """One-time relayout of PyTorch-layout GRUCell parameters.

    weight_ih: (3H, D), weight_hh: (3H, H), biases: (3H,)  (gate order r, z, n).
    Weights are stored in `compute_dtype` (bf16 by default: full-rate MXU, half
    the HBM/VMEM bytes); biases stay f32.  Columns are grouped per hidden tile
    as contiguous [r | z | n] blocks so the kernel can stream one hidden tile of
    weights per grid step.  Call once at parameter-setup time, NOT per step.
    """
    three_h, D = weight_ih.shape
    H = three_h // 3
    assert weight_ih.shape == (3 * H, D)
    assert weight_hh.shape == (3 * H, H)
    Hp = _round_up(H, 128)

    wt_itemsize = jnp.dtype(compute_dtype).itemsize
    if hidden_tile is None:
        hidden_tile = _auto_hidden_tile(D, Hp, wt_itemsize)
    th = hidden_tile
    assert th % 128 == 0 and Hp % th == 0, "hidden_tile must be a 128-multiple dividing Hp"
    n_ht = Hp // th

    def gate_slab(w):
        # w: (3H, K) -> (K, 3*Hp), tile-major, gate-inner:
        #   cols [j*3*th : (j+1)*3*th] = [r_j | z_j | n_j] for hidden slice j.
        wt = [jnp.pad(w[g * H:(g + 1) * H, :].T, ((0, 0), (0, Hp - H))) for g in range(3)]
        cols = []
        for j in range(n_ht):
            for g in range(3):
                cols.append(wt[g][:, j * th:(j + 1) * th])
        return jnp.concatenate(cols, axis=1)

    w_i = gate_slab(weight_ih).astype(compute_dtype)                  # (D,  3*Hp)
    w_h = gate_slab(weight_hh)                                        # (H,  3*Hp)
    w_h = jnp.pad(w_h, ((0, Hp - H), (0, 0))).astype(compute_dtype)   # (Hp, 3*Hp)

    bi = bias_ih.astype(jnp.float32)
    bh = bias_hh.astype(jnp.float32)

    def bgate(b, g):
        return jnp.pad(b[g * H:(g + 1) * H], (0, Hp - H))

    br = bgate(bi, 0) + bgate(bh, 0)
    bz = bgate(bi, 1) + bgate(bh, 1)
    bn = bgate(bi, 2)
    # Fused gate bias, same tile-major [r|z|n] layout as the weight columns.
    b_g = jnp.concatenate(
        [jnp.concatenate([br[j * th:(j + 1) * th],
                          bz[j * th:(j + 1) * th],
                          bn[j * th:(j + 1) * th]]) for j in range(n_ht)]
    ).reshape(1, 3 * Hp)
    # b_hn must stay inside the r-multiply; natural hidden order (tile j = cols j*th..).
    b_hn = bgate(bh, 2).reshape(1, Hp)

    return {"w_i": w_i, "w_h": w_h, "b_g": b_g, "b_hn": b_hn,
            "D": D, "H": H, "Hp": Hp, "tile_h": th, "n_ht": n_ht}


def gru_cell(x, h, params, *, batch_tile=None, padded_io=False):
    """Pallas GRUCell forward using parameters from prepare_gru_params().

    x: (B, D), h: (B, H)  ->  h': (B, H).
    With padded_io=True, x: (Bp, D), h: (Bp, Hp) -> h': (Bp, Hp) (no per-step
    pad/slice HBM passes; keep h persistently padded across a sequence).
    """
    B, D = x.shape
    H, Hp, th, n_ht = params["H"], params["Hp"], params["tile_h"], params["n_ht"]
    assert D == params["D"]

    kind = _tpu_kind()
    if batch_tile is None:
        big_mxu = not ("v5e" in kind or "v5 lite" in kind or "v5lite" in kind)
        if B >= 256 and big_mxu:
            batch_tile = 256       # fill the 256-wide MXU M dim on v6e/v7x
        elif B >= 128:
            batch_tile = 128
        else:
            batch_tile = _round_up(max(B, 1), 8)
    tb = batch_tile
    Bp = _round_up(B, tb)

    if padded_io:
        assert x.shape[0] % tb == 0 and h.shape == (x.shape[0], Hp)
        Bp = x.shape[0]
        xp, hp = x, h
    else:
        assert h.shape == (B, H)
        xp = x if Bp == B else jnp.pad(x, ((0, Bp - B), (0, 0)))
        hp = h if (Bp == B and Hp == H) else jnp.pad(h, ((0, Bp - B), (0, Hp - H)))

    w_i, w_h, b_g, b_hn = params["w_i"], params["w_h"], params["b_g"], params["b_hn"]

    # Honest VMEM budget: 2x-buffered per-tile weight/bias slabs, double-buffered
    # streamed x/h/out tiles, plus f32 intermediates (gi, gh, gate temps).
    in_isz = jnp.dtype(x.dtype).itemsize
    wt_isz = jnp.dtype(w_i.dtype).itemsize
    weight_tile_bytes = (D + Hp) * 3 * th * wt_isz
    bias_tile_bytes = (3 * th + th) * 4
    stream_bytes = 2 * (tb * D + tb * Hp + tb * th) * in_isz
    interm_bytes = (2 * tb * 3 * th + 4 * tb * th) * 4
    est_vmem = 2 * (weight_tile_bytes + bias_tile_bytes) + stream_bytes + interm_bytes

    cap = (56 << 20) if "v7" in kind else (100 << 20)
    vmem_limit = int(min(max(est_vmem * 1.5 + (4 << 20), 32 << 20), cap))
    compiler_params = pltpu.CompilerParams(
        dimension_semantics=("parallel", "parallel"),
        vmem_limit_bytes=vmem_limit,
    )

    # Grid: (hidden tiles, batch tiles).  Batch is the inner (fastest) axis, so
    # the weight/bias blocks are revisited (constant index) across it and stay
    # VMEM-resident while x / h / out stream.
    out = pl.pallas_call(
        _gru_cell_kernel,
        out_shape=jax.ShapeDtypeStruct((Bp, Hp), x.dtype),
        grid=(n_ht, Bp // tb),
        in_specs=[
            pl.BlockSpec((tb, D), lambda j, i: (i, 0)),            # x tile (streams)
            pl.BlockSpec((tb, Hp), lambda j, i: (i, 0)),           # h tile (streams)
            pl.BlockSpec((D, 3 * th), lambda j, i: (0, j)),        # W_i hidden-tile slab
            pl.BlockSpec((Hp, 3 * th), lambda j, i: (0, j)),       # W_h hidden-tile slab
            pl.BlockSpec((1, 3 * th), lambda j, i: (0, j)),        # fused gate bias
            pl.BlockSpec((1, th), lambda j, i: (0, j)),            # b_hn
        ],
        out_specs=pl.BlockSpec((tb, th), lambda j, i: (i, j)),
        compiler_params=compiler_params,
    )(xp, hp, w_i, w_h, b_g, b_hn)

    if padded_io:
        return out
    return out[:B, :H]


def gru_cell_ref(x, h, weight_ih, weight_hh, bias_ih, bias_hh):
    """Pure-JAX reference matching torch.nn.GRUCell."""
    H = h.shape[1]
    gi = x @ weight_ih.T + bias_ih
    gh = h @ weight_hh.T + bias_hh
    i_r, i_z, i_n = gi[:, :H], gi[:, H:2 * H], gi[:, 2 * H:]
    h_r, h_z, h_n = gh[:, :H], gh[:, H:2 * H], gh[:, 2 * H:]
    r = jax.nn.sigmoid(i_r + h_r)
    z = jax.nn.sigmoid(i_z + h_z)
    n = jnp.tanh(i_n + r * h_n)
    return (1.0 - z) * n + z * h


def _make_problem(key, B, D, H):
    kx, kh, k1, k2, k3, k4 = jax.random.split(key, 6)
    x = jax.random.normal(kx, (B, D), dtype=jnp.float32)
    h = jax.random.normal(kh, (B, H), dtype=jnp.float32)
    bound = 1.0 / jnp.sqrt(jnp.float32(H))
    weight_ih = jax.random.uniform(k1, (3 * H, D), minval=-bound, maxval=bound, dtype=jnp.float32)
    weight_hh = jax.random.uniform(k2, (3 * H, H), minval=-bound, maxval=bound, dtype=jnp.float32)
    bias_ih = jax.random.uniform(k3, (3 * H,), minval=-bound, maxval=bound, dtype=jnp.float32)
    bias_hh = jax.random.uniform(k4, (3 * H,), minval=-bound, maxval=bound, dtype=jnp.float32)
    return x, h, weight_ih, weight_hh, bias_ih, bias_hh


if __name__ == "__main__":
    key = jax.random.PRNGKey(0)
    k_small, k_big = jax.random.split(key)

    # --- Check 1: exact semantics (f32 weights), small shapes -----------------
    B, D, H = 8, 16, 32
    x, h, w_ih, w_hh, b_ih, b_hh = _make_problem(k_small, B, D, H)
    ref = gru_cell_ref(x, h, w_ih, w_hh, b_ih, b_hh)

    params_f32 = prepare_gru_params(w_ih, w_hh, b_ih, b_hh, compute_dtype=jnp.float32)
    out_f32 = jax.block_until_ready(gru_cell(x, h, params_f32))
    assert out_f32.shape == (B, H)
    assert jnp.allclose(out_f32, ref, atol=1e-5, rtol=1e-5), "f32 mismatch vs reference"

    # --- Check 2: default bf16 weights (recommended fast path) ----------------
    params_bf16 = prepare_gru_params(w_ih, w_hh, b_ih, b_hh)   # bf16 default
    out_bf16 = jax.block_until_ready(gru_cell(x, h, params_bf16))
    assert out_bf16.shape == (B, H)
    assert jnp.allclose(out_bf16, ref, atol=5e-2, rtol=5e-2), "bf16 mismatch vs reference"

    # --- Check 3: hidden-dim tiling path (n_ht=2), f32 weights ----------------
    B2, D2, H2 = 16, 64, 256
    x2, h2, w_ih2, w_hh2, b_ih2, b_hh2 = _make_problem(k_big, B2, D2, H2)
    ref2 = gru_cell_ref(x2, h2, w_ih2, w_hh2, b_ih2, b_hh2)
    params2 = prepare_gru_params(w_ih2, w_hh2, b_ih2, b_hh2,
                                 compute_dtype=jnp.float32, hidden_tile=128)
    assert params2["n_ht"] == 2
    out2 = jax.block_until_ready(gru_cell(x2, h2, params2))
    assert out2.shape == (B2, H2)
    assert jnp.allclose(out2, ref2, atol=1e-4, rtol=1e-4), "tiled mismatch vs reference"

    print("KERNEL_OK")
</pallas_src>

<mosaic_0001>
module attributes {stable_mosaic.version = 11 : i64} {
  func.func @_gru_cell_kernel(%arg0: i32, %arg1: i32, %arg2: memref<8x16xf32, #tpu.memory_space<vmem>>, %arg3: memref<8x128xf32, #tpu.memory_space<vmem>>, %arg4: memref<16x384xf32, #tpu.memory_space<vmem>>, %arg5: memref<128x384xf32, #tpu.memory_space<vmem>>, %arg6: memref<1x384xf32, #tpu.memory_space<vmem>>, %arg7: memref<1x128xf32, #tpu.memory_space<vmem>>, %arg8: memref<8x128xf32, #tpu.memory_space<vmem>>) attributes {dimension_semantics = [#tpu.dimension_semantics<parallel>, #tpu.dimension_semantics<parallel>], iteration_bounds = array<i64: 1, 1>, scalar_prefetch = 0 : i64, scratch_operands = 0 : i64, tpu.core_type = #tpu.core_type<tc>, window_params = [{transform_indices = @transform_0, window_bounds = array<i64: 8, 16>}, {transform_indices = @transform_1, window_bounds = array<i64: 8, 128>}, {transform_indices = @transform_2, window_bounds = array<i64: 16, 384>}, {transform_indices = @transform_3, window_bounds = array<i64: 128, 384>}, {transform_indices = @transform_4, window_bounds = array<i64: 1, 384>}, {transform_indices = @transform_5, window_bounds = array<i64: 1, 128>}, {transform_indices = @transform_6, window_bounds = array<i64: 8, 128>}]} {
    %c0 = arith.constant 0 : index
    %c0_0 = arith.constant 0 : index
    %0 = vector.load %arg3[%c0, %c0_0] : memref<8x128xf32, #tpu.memory_space<vmem>>, vector<8x128xf32>
    %c0_1 = arith.constant 0 : index
    %c0_2 = arith.constant 0 : index
    %1 = vector.load %arg2[%c0_1, %c0_2] : memref<8x16xf32, #tpu.memory_space<vmem>>, vector<8x16xf32>
    %c0_3 = arith.constant 0 : index
    %c0_4 = arith.constant 0 : index
    %2 = vector.load %arg4[%c0_3, %c0_4] : memref<16x384xf32, #tpu.memory_space<vmem>>, vector<16x384xf32>
    %cst = arith.constant dense<0.000000e+00> : vector<8x384xf32>
    %3 = tpu.matmul %1, %2, %cst {dimension_numbers = #tpu.dot_dimension_numbers<[1], [0], [0], [1], [0, 0, 1, 1], [], []>} : vector<8x16xf32>, vector<16x384xf32>, vector<8x384xf32> -> vector<8x384xf32>
    %c0_5 = arith.constant 0 : index
    %c0_6 = arith.constant 0 : index
    %4 = vector.load %arg6[%c0_5, %c0_6] : memref<1x384xf32, #tpu.memory_space<vmem>>, vector<1x384xf32>
    %5 = vector.broadcast %4 : vector<1x384xf32> to vector<8x384xf32>
    %6 = arith.addf %3, %5 : vector<8x384xf32>
    %c0_7 = arith.constant 0 : index
    %c0_8 = arith.constant 0 : index
    %7 = vector.load %arg5[%c0_7, %c0_8] : memref<128x384xf32, #tpu.memory_space<vmem>>, vector<128x384xf32>
    %cst_9 = arith.constant dense<0.000000e+00> : vector<8x384xf32>
    %8 = tpu.matmul %0, %7, %cst_9 {dimension_numbers = #tpu.dot_dimension_numbers<[1], [0], [0], [1], [0, 0, 1, 1], [], []>} : vector<8x128xf32>, vector<128x384xf32>, vector<8x384xf32> -> vector<8x384xf32>
    %9 = vector.extract_strided_slice %6 {offsets = [0, 0], sizes = [8, 128], strides = [1, 1]} : vector<8x384xf32> to vector<8x128xf32>
    %10 = vector.extract_strided_slice %8 {offsets = [0, 0], sizes = [8, 128], strides = [1, 1]} : vector<8x384xf32> to vector<8x128xf32>
    %11 = arith.addf %9, %10 : vector<8x128xf32>
    %cst_10 = arith.constant 5.000000e-01 : f32
    %12 = vector.broadcast %cst_10 : f32 to vector<8x128xf32>
    %13 = arith.mulf %12, %11 : vector<8x128xf32>
    %14 = math.tanh %13 : vector<8x128xf32>
    %cst_11 = arith.constant 5.000000e-01 : f32
    %15 = vector.broadcast %cst_11 : f32 to vector<8x128xf32>
    %16 = arith.mulf %15, %14 : vector<8x128xf32>
    %cst_12 = arith.constant 5.000000e-01 : f32
    %17 = vector.broadcast %cst_12 : f32 to vector<8x128xf32>
    %18 = arith.addf %16, %17 : vector<8x128xf32>
    %19 = vector.extract_strided_slice %6 {offsets = [0, 128], sizes = [8, 128], strides = [1, 1]} : vector<8x384xf32> to vector<8x128xf32>
    %20 = vector.extract_strided_slice %8 {offsets = [0, 128], sizes = [8, 128], strides = [1, 1]} : vector<8x384xf32> to vector<8x128xf32>
    %21 = arith.addf %19, %20 : vector<8x128xf32>
    %cst_13 = arith.constant 5.000000e-01 : f32
    %22 = vector.broadcast %cst_13 : f32 to vector<8x128xf32>
    %23 = arith.mulf %22, %21 : vector<8x128xf32>
    %24 = math.tanh %23 : vector<8x128xf32>
    %cst_14 = arith.constant 5.000000e-01 : f32
    %25 = vector.broadcast %cst_14 : f32 to vector<8x128xf32>
    %26 = arith.mulf %25, %24 : vector<8x128xf32>
    %cst_15 = arith.constant 5.000000e-01 : f32
    %27 = vector.broadcast %cst_15 : f32 to vector<8x128xf32>
    %28 = arith.addf %26, %27 : vector<8x128xf32>
    %29 = vector.extract_strided_slice %6 {offsets = [0, 256], sizes = [8, 128], strides = [1, 1]} : vector<8x384xf32> to vector<8x128xf32>
    %30 = vector.extract_strided_slice %8 {offsets = [0, 256], sizes = [8, 128], strides = [1, 1]} : vector<8x384xf32> to vector<8x128xf32>
    %c0_16 = arith.constant 0 : index
    %c0_17 = arith.constant 0 : index
    %31 = vector.load %arg7[%c0_16, %c0_17] : memref<1x128xf32, #tpu.memory_space<vmem>>, vector<1x128xf32>
    %32 = vector.broadcast %31 : vector<1x128xf32> to vector<8x128xf32>
    %33 = arith.addf %30, %32 : vector<8x128xf32>
    %34 = arith.mulf %18, %33 : vector<8x128xf32>
    %35 = arith.addf %29, %34 : vector<8x128xf32>
    %36 = math.tanh %35 : vector<8x128xf32>
    %37 = arith.subf %0, %36 : vector<8x128xf32>
    %38 = arith.mulf %28, %37 : vector<8x128xf32>
    %39 = arith.addf %36, %38 : vector<8x128xf32>
    %c0_18 = arith.constant 0 : index
    %c0_19 = arith.constant 0 : index
    %40 = vector.load %arg8[%c0_18, %c0_19] : memref<8x128xf32, #tpu.memory_space<vmem>>, vector<8x128xf32>
    tpu.vector_store %arg8[%c0_18, %c0_19], %39 {strides = array<i32>} : memref<8x128xf32, #tpu.memory_space<vmem>>, vector<8x128xf32>,
    return
  }
  func.func @transform_0(%arg0: i32, %arg1: i32) -> (i32, i32) {
    %c0_i32 = arith.constant 0 : i32
    %c0_i32_0 = arith.constant 0 : i32
    return %arg1, %c0_i32 : i32, i32
  }
  func.func @transform_1(%arg0: i32, %arg1: i32) -> (i32, i32) {
    %c0_i32 = arith.constant 0 : i32
    %c0_i32_0 = arith.constant 0 : i32
    return %arg1, %c0_i32 : i32, i32
  }
  func.func @transform_2(%arg0: i32, %arg1: i32) -> (i32, i32) {
    %c0_i32 = arith.constant 0 : i32
    %c0_i32_0 = arith.constant 0 : i32
    return %c0_i32, %arg0 : i32, i32
  }
  func.func @transform_3(%arg0: i32, %arg1: i32) -> (i32, i32) {
    %c0_i32 = arith.constant 0 : i32
    %c0_i32_0 = arith.constant 0 : i32
    return %c0_i32, %arg0 : i32, i32
  }
  func.func @transform_4(%arg0: i32, %arg1: i32) -> (i32, i32) {
    %c0_i32 = arith.constant 0 : i32
    %c0_i32_0 = arith.constant 0 : i32
    return %c0_i32, %arg0 : i32, i32
  }
  func.func @transform_5(%arg0: i32, %arg1: i32) -> (i32, i32) {
    %c0_i32 = arith.constant 0 : i32
    %c0_i32_0 = arith.constant 0 : i32
    return %c0_i32, %arg0 : i32, i32
  }
  func.func @transform_6(%arg0: i32, %arg1: i32) -> (i32, i32) {
    %c0_i32 = arith.constant 0 : i32
    return %arg1, %arg0 : i32, i32
  }
}

</mosaic_0001>

<bundles_post_ra>
// kernel: tpu_custom_call.1
= control target key start
LH: loop header
LB: loop body
LE: loop exit
PB: predicated region body
PF: predicated region fallthrough
CT: control target
= control target key end

     0   :  { %11 = vsyncpa [#allocation3], 0  ;;  %s528_s0 = inlined_call_operand.hbm [shape: f32[8,16], index: 0, kind: input, shape index: {}]   ;;  %s529_s1 = inlined_call_operand.hbm [shape: f32[8,128], index: 1, kind: input, shape index: {}]   ;;  %s530_s2 = inlined_call_operand.hbm [shape: f32[16,384], index: 2, kind: input, shape index: {}]   ;;  %s531_s3 = inlined_call_operand.hbm [shape: f32[128,384], index: 3, kind: input, shape index: {}]   ;;  %s532_s4 = inlined_call_operand.vmem [shape: f32[1,384], index: 4, kind: input, shape index: {}]   ;;  %s533_s5 = inlined_call_operand.vmem [shape: f32[1,128], index: 5, kind: input, shape index: {}]   ;;  %s534_s6 = inlined_call_operand.hbm [shape: f32[8,128], index: 6, kind: output, shape index: {}]  }
   0x1   :  { %12 = vsyncpa [#allocation6], 0 }
   0x2   :  { %13 = vsyncpa [#allocation9], 0  ;;  %s31_s23 = sshll.u32 %s529_s1, 4  ;;  %s32_s23 = int_to_ptr.hbm [resolvable:$true] %s31_s23 }
   0x3   :  { %14 = vsyncpa [#allocation4], 0  ;;  %s457_s24 = smov [#allocation5]   ;;  %s20_s28 = sshll.u32 %s528_s0, 4  ;;  %s21_s28 = int_to_ptr.hbm [resolvable:$true] %s20_s28 }
   0x4   :  { %s33_s25 = sshll.u32 %s457_s24, 4  ;;  %s458_s29 = smov [#allocation2]   ;;  %s34_s25 = int_to_ptr.vmem [resolvable:$true] %s33_s25 }
   0x5   :  { %36 = dma.hbm_to_vmem [thread:$0]  %s32_s23, 128, %s34_s25, [#allocation6]  }
   0x6   :  { %s22_s30 = sshll.u32 %s458_s29, 4  ;;  %s41_s9 = sshll.u32 %s530_s2, 4  ;;  %s23_s30 = int_to_ptr.vmem [resolvable:$true] %s22_s30  ;;  %s42_s9 = int_to_ptr.hbm [resolvable:$true] %s41_s9 }
   0x7   :  { %25 = dma.hbm_to_vmem [thread:$0]  %s21_s28, 128, %s23_s30, [#allocation3]  }
   0x8   :  { %s459_s1 = smov [#allocation7]   ;;  %s54_s13 = sshll.u32 %s531_s3, 4  ;;  %s55_s13 = int_to_ptr.hbm [resolvable:$true] %s54_s13 }
   0x9   :  { %s43_s10 = sshll.u32 %s459_s1, 4  ;;  %s460_s14 = smov 384   ;;  %s44_s10 = int_to_ptr.vmem [resolvable:$true] %s43_s10 }
   0xa   :  { %s461_s0 = smov 24   ;;  %s462_s15 = smov [#allocation8]  }
   0xb   :  { %49 = dma.hbm_to_vmem [thread:$0]  %s42_s9, 768, %s44_s10, [#allocation6], %s460_s14, %s460_s14, %s461_s0  }
   0xc   :  { %s56_s16 = sshll.u32 %s462_s15, 4  ;;  %s57_s16 = int_to_ptr.vmem [resolvable:$true] %s56_s16 }
   0xd   :  { %62 = dma.hbm_to_vmem [thread:$0]  %s55_s13, 6144, %s57_s16, [#allocation9], %s460_s14, %s460_s14, %s461_s0  }
   0xe   :  { %449 = dma.done.wait [#allocation3], 128  }
   0xf   :  { %450 = vsyncadd [#allocation3], 4294967168 }
  0x10   :  { %451 = dma.done.wait [#allocation6], 896  }
  0x11   :  { %452 = vsyncadd [#allocation6], 4294966400 }
  0x12   :  { %453 = dma.done.wait [#allocation9], 6144  }
  0x13   :  { %454 = vsyncadd [#allocation9], 4294961152  ;;  %v208_v0 = vld [vmem:[#allocation8 + $0x168] sm:$0xff]  ;;  %v205_v1 = vld [vmem:[#allocation8 + $0x150] sm:$0xff]  ;;  %vm99_vm0 = vcmask 130048   ;;  %s300_s21 = sshll.u32 %s534_s6, 4  ;;  %s301_s21 = int_to_ptr.hbm [resolvable:$true] %s300_s21 }
  0x14   :  { %211 = vmatpush.msra.mxu3 %v208_v0  ;;  %v202_v2 = vld [vmem:[#allocation8 + $0x138] sm:$0xff]  ;;  %v209_v3 = vld [vmem:[#allocation8 + $0x170] sm:$0xff]  ;;  %v199_v5 = vld [vmem:[#allocation8 + $0x120] sm:$0xff] }
  0x15   :  { %231 = vmatpush.msra.mxu0 %v209_v3  ;;  %v206_v4 = vld [vmem:[#allocation8 + $0x158] sm:$0xff]  ;;  %v203_v6 = vld [vmem:[#allocation8 + $0x140] sm:$0xff]  ;;  %v196_v9 = vld [vmem:[#allocation8 + $0x108] sm:$0xff] }
  0x16   :  { %212 = vmatpush.msra.mxu3 %v205_v1  ;;  %v210_v7 = vld [vmem:[#allocation8 + $0x178] sm:$0xff]  ;;  %v207_v8 = vld [vmem:[#allocation8 + $0x160] sm:$0xff]  ;;  %v200_v10 = vld [vmem:[#allocation8 + $0x128] sm:$0xff] }
  0x17   :  { %232 = vmatpush.msra.mxu0 %v206_v4  ;;  %251 = vmatpush.msra.mxu1 %v210_v7  ;;  %v204_v11 = vld [vmem:[#allocation8 + $0x148] sm:$0xff]  ;;  %v193_v13 = vld [vmem:[#allocation8 + $0xf0] sm:$0xff]  ;;  %v511_v17 = vld [vmem:[#allocation2] sm:$0xff] }
  0x18   :  { %213 = vmatpush.msra.mxu3 %v202_v2  ;;  %v88_v12 = vld [vmem:[#allocation7 + $0x18] sm:$0xff]  ;;  %v197_v14 = vld [vmem:[#allocation8 + $0x110] sm:$0xff]  ;;  %v190_v18 = vld [vmem:[#allocation8 + $0xd8] sm:$0xff] }
  0x19   :  { %233 = vmatpush.msra.mxu0 %v203_v6  ;;  %252 = vmatpush.msra.mxu1 %v207_v8  ;;  %v201_v15 = vld [vmem:[#allocation8 + $0x130] sm:$0xff]  ;;  %v194_v19 = vld [vmem:[#allocation8 + $0xf8] sm:$0xff]  ;;  %v187_v22 = vld [vmem:[#allocation8 + $0xc0] sm:$0xff] }
  0x1a   :  { %214 = vmatpush.msra.mxu3 %v199_v5  ;;  %117 = vmatpush.msra.mxu2 %v88_v12  ;;  %v85_v16 = vld [vmem:[#allocation7] sm:$0xff]  ;;  %v198_v20 = vld [vmem:[#allocation8 + $0x118] sm:$0xff]  ;;  %v191_v23 = vld [vmem:[#allocation8 + $0xe0] sm:$0xff] }
  0x1b   :  { %234 = vmatpush.msra.mxu0 %v200_v10  ;;  %253 = vmatpush.msra.mxu1 %v204_v11  ;;  %v89_v21 = vld [vmem:[#allocation7 + $0x20] sm:$0xff]  ;;  %v195_v24 = vld [vmem:[#allocation8 + $0x100] sm:$0xff]  ;;  %v86_v25 = vld [vmem:[#allocation7 + $0x8] sm:$0xff] }
  0x1c   :  { %215 = vmatpush.msra.mxu3 %v196_v9  ;;  %118 = vmatpush.msra.mxu2 %v85_v16  ;;  %v184_v26 = vld [vmem:[#allocation8 + $0xa8] sm:$0xff]  ;;  %v90_v29 = vld [vmem:[#allocation7 + $0x28] sm:$0xff]  ;;  %v181_v30 = vld [vmem:[#allocation8 + $0x90] sm:$0xff] }
  0x1d   :  { %235 = vmatpush.msra.mxu0 %v197_v14  ;;  %254 = vmatpush.msra.mxu1 %v201_v15  ;;  %v188_v27 = vld [vmem:[#allocation8 + $0xc8] sm:$0xff]  ;;  %v185_v31 = vld [vmem:[#allocation8 + $0xb0] sm:$0xff]  ;;  %v178_v33 = vld [vmem:[#allocation8 + $0x78] sm:$0xff] }
  0x1e   :  { %216 = vmatpush.msra.mxu3 %v193_v13  ;;  %312 = vmatmul.msk.f32.vlgmr.msra.gmra.mxu2 %vm99_vm0, %v511_v17  ;;  %v192_v28 = vld [vmem:[#allocation8 + $0xe8] sm:$0xff]  ;;  %v189_v32 = vld [vmem:[#allocation8 + $0xd0] sm:$0xff]  ;;  %v182_v34 = vld [vmem:[#allocation8 + $0x98] sm:$0xff] }
  0x1f   :  { %236 = vmatpush.msra.mxu0 %v194_v19  ;;  %255 = vmatpush.msra.mxu1 %v198_v20  ;;  %v186_v35 = vld [vmem:[#allocation8 + $0xb8] sm:$0xff]  ;;  %v87_v36 = vld [vmem:[#allocation7 + $0x10] sm:$0xff]  ;;  %v172_v40 = vld [vmem:[#allocation8 + $0x48] sm:$0xff] }
  0x20   :  { %217 = vmatpush.msra.mxu3 %v190_v18  ;;  %137 = vmatpush.msrb.mxu2 %v89_v21  ;;  %v175_v37 = vld [vmem:[#allocation8 + $0x60] sm:$0xff]  ;;  %v176_v41 = vld [vmem:[#allocation8 + $0x68] sm:$0xff]  ;;  %v169_v43 = vld [vmem:[#allocation8 + $0x30] sm:$0xff] }
  0x21   :  { %237 = vmatpush.msra.mxu0 %v191_v23  ;;  %256 = vmatpush.msra.mxu1 %v195_v24  ;;  %v179_v38 = vld [vmem:[#allocation8 + $0x80] sm:$0xff]  ;;  %v180_v42 = vld [vmem:[#allocation8 + $0x88] sm:$0xff]  ;;  %v173_v44 = vld [vmem:[#allocation8 + $0x50] sm:$0xff] }
  0x22   :  { %218 = vmatpush.msra.mxu3 %v187_v22  ;;  %138 = vmatpush.msrb.mxu2 %v86_v25  ;;  %v183_v39 = vld [vmem:[#allocation8 + $0xa0] sm:$0xff]  ;;  %v177_v45 = vld [vmem:[#allocation8 + $0x70] sm:$0xff]  ;;  %v166_v46 = vld [vmem:[#allocation8 + $0x18] sm:$0xff] }
  0x23   :  { %238 = vmatpush.msra.mxu0 %v188_v27  ;;  %257 = vmatpush.msra.mxu1 %v192_v28  ;;  %v170_v47 = vld [vmem:[#allocation8 + $0x38] sm:$0xff]  ;;  %v163_v49 = vld [vmem:[#allocation8] sm:$0xff]  ;;  %v83_v51 = vld [vmem:[#allocation5] sm:$0xff] }
  0x24   :  { %219 = vmatpush.msra.mxu3 %v184_v26  ;;  %157 = vmatpush.msra.mxu2 %v90_v29  ;;  %v174_v48 = vld [vmem:[#allocation8 + $0x58] sm:$0xff]  ;;  %v167_v50 = vld [vmem:[#allocation8 + $0x20] sm:$0xff]  ;;  %v164_v53 = vld [vmem:[#allocation8 + $0x8] sm:$0xff] }
  0x25   :  { %239 = vmatpush.msra.mxu0 %v185_v31  ;;  %258 = vmatpush.msra.mxu1 %v189_v32  ;;  %v171_v52 = vld [vmem:[#allocation8 + $0x40] sm:$0xff]  ;;  %v168_v54 = vld [vmem:[#allocation8 + $0x28] sm:$0xff]  ;;  %v165_v55 = vld [vmem:[#allocation8 + $0x10] sm:$0xff] }
  0x26   :  { %220 = vmatpush.msra.mxu3 %v181_v30  ;;  %313 = vmatmul.msk.f32.vlgmr.msrb.gmra.mxu2 %vm99_vm0, %v511_v17  ;;  %v91_v57 = vld [vmem:[%s532_s4] sm:$0x7]  ;;  %s463_s4 = smov [#allocation10]  }
  0x27   :  { %240 = vmatpush.msra.mxu0 %v182_v34  ;;  %259 = vmatpush.msra.mxu1 %v186_v35  ;;  %v93_v58 = vperm.slane %v91_v57, 0  ;;  %v94_v60 = vperm.slane %v91_v57, 1  ;;  %v322_v4 = vld [vmem:[%s533_s5] ss:$0 sm:$0xff]  ;;  %v95_v7 = vperm.slane %v91_v57, 2  ;;  %s298_s5 = sshll.u32 %s463_s4, 4  ;;  %s299_s5 = int_to_ptr.vmem [resolvable:$true] %s298_s5 }
  0x28   :  { %221 = vmatpush.msra.mxu3 %v178_v33  ;;  %158 = vmatpush.msra.mxu2 %v87_v36 }
  0x29   :  { %241 = vmatpush.msra.mxu0 %v179_v38  ;;  %260 = vmatpush.msra.mxu1 %v183_v39 }
  0x2a   :  { %222 = vmatpush.msra.mxu3 %v175_v37 }
  0x2b   :  { %242 = vmatpush.msra.mxu0 %v176_v41  ;;  %261 = vmatpush.msra.mxu1 %v180_v42 }
  0x2c   :  { %223 = vmatpush.msra.mxu3 %v172_v40 }
  0x2d   :  { %243 = vmatpush.msra.mxu0 %v173_v44  ;;  %262 = vmatpush.msra.mxu1 %v177_v45 }
  0x2e   :  { %224 = vmatpush.msra.mxu3 %v169_v43  ;;  %314 = vmatmul.msk.f32.vlgmr.msra.gmra.mxu2 %vm99_vm0, %v511_v17 }
  0x2f   :  { %244 = vmatpush.msra.mxu0 %v170_v47  ;;  %263 = vmatpush.msra.mxu1 %v174_v48 }
  0x30   :  { %225 = vmatpush.msra.mxu3 %v166_v46 }
  0x31   :  { %245 = vmatpush.msra.mxu0 %v167_v50  ;;  %264 = vmatpush.msra.mxu1 %v171_v52 }
  0x32   :  { %226 = vmatpush.msra.mxu3 %v163_v49 }
  0x33   :  { %227 = vmatmul.f32.vlgmr.msra.gmra.mxu3 %v83_v51  ;;  %246 = vmatpush.msra.mxu0 %v164_v53 }
  0x34   :  { %247 = vmatmul.f32.vlgmr.msra.gmra.mxu0 %v83_v51  ;;  %265 = vmatpush.msra.mxu1 %v168_v54 }
  0x36   :  { %266 = vmatpush.msra.mxu1 %v165_v55 }
  0x37   :  { %267 = vmatmul.f32.vlgmr.msra.gmra.mxu1 %v83_v51 }
  0xa1   :  { %v120_v56 = vpop.f32.mrf.mxu2 }
  0xa2   :  { %v121_v59 = vadd.f32 %v120_v56, %v93_v58 }
  0xa9   :  { %v140_v61 = vpop.f32.mrf.mxu2 }
  0xaa   :  { %v141_v0 = vadd.f32 %v140_v61, %v94_v60 }
  0xb1   :  { %v248_v2 = vpop.f32.mrf.mxu0  ;;  %v160_v9 = vpop.f32.mrf.mxu2 }
  0xb2   :  { %v276_v3 = vadd.f32 %v248_v2, %v141_v0  ;;  %v161_v13 = vadd.f32 %v160_v9, %v95_v7 }
  0xb4   :  { %v268_v5 = vpop.f32.mrf.mxu1  ;;  %v277_v6 = vmul.f32 0.5, %v276_v3 }
  0xb5   :  { %v285_v11 = vadd.f32 %v322_v4, %v268_v5 }
  0xb6   :  { %v228_v62 = vpop.f32.mrf.mxu3 }
  0xb7   :  { %v271_v63 = vadd.f32 %v228_v62, %v121_v59 }
  0xb9   :  { %v272_v1 = vmul.f32 0.5, %v271_v63 }
  0xbb   :  { %323 = vtanh.f32 %v272_v1 }
  0xbc   :  { %325 = vtanh.f32 %v277_v6 }
  0xc1   :  { %v324_v8 = vpop.eup %323 }
  0xc2   :  { %v274_v10 = vmul.f32 0.5, %v324_v8  ;;  %v326_v16 = vpop.eup %325 }
  0xc3   :  { %v279_v17 = vmul.f32 0.5, %v326_v16 }
  0xc4   :  { %v275_v12 = vadd.f32 0.5, %v274_v10 }
  0xc5   :  { %v280_v19 = vadd.f32 0.5, %v279_v17 }
  0xc6   :  { %v286_v14 = vmul.f32 %v285_v11, %v275_v12 }
  0xc8   :  { %v287_v15 = vadd.f32 %v286_v14, %v161_v13 }
  0xca   :  { %327 = vtanh.f32 %v287_v15 }
  0xd0   :  { %v328_v18 = vpop.eup %327 }
  0xd1   :  { %v289_v20 = vsub.f32 %v83_v51, %v328_v18 }
  0xd3   :  { %v290_v21 = vmul.f32 %v289_v20, %v280_v19 }
  0xd5   :  { %v291_v22 = vadd.f32 %v328_v18, %v290_v21 }
  0xd7   :  { %292 = vst [vmem:[#allocation10] sm:$0xff] %v291_v22 }
  0xd8   :  { %303 = dma.vmem_to_hbm [thread:$0]  %s299_s5, 128, %s301_s21, [#allocation4]  }
  0xd9   :  { %455 = dma.done.wait [#allocation4], 128  }
  0xda   :  { %456 = vsyncadd [#allocation4], 4294967168 }
  0xdb   :  { %308 = vsyncpa [#allocation3], 1 }
  0xdc   :  { %309 = vsyncpa [#allocation6], 1 }
  0xdd   :  { %310 = vsyncpa [#allocation9], 1 }
  0xde   :  { %311 = vsyncpa [#allocation4], 1 }

</bundles_post_ra>
